<compile_context>
chip_gen: v5e
topology: v5e:2x2
jax: 0.10.0
libtpu: 0.0.40
codegen_flags: <defaults>
</compile_context>

<pallas_src>
import jax
import jax.numpy as jnp
from jax.experimental import pallas as pl
from jax.experimental.pallas import tpu as pltpu


LANE = 128      # pad feature dims to multiples of the 128-lane vreg / MXU width
SUBLANE = 16    # bf16 sublane packing -> batch-tile granularity
MAX_TM = 1024   # max batch tile rows (VMEM footprint is tiny; amortize step overhead)
NUM_LAYERS = 8


def _round_up(n, m):
    return ((n + m - 1) // m) * m


def _choose_tiling(B):
    """Balanced batch tiles; >=2 grid steps when possible (v7x dual-TC)."""
    n_tiles = pl.cdiv(B, MAX_TM)
    if B >= 2 * SUBLANE:
        n_tiles = max(n_tiles, 2)
    tm = _round_up(pl.cdiv(B, n_tiles), SUBLANE)
    grid_len = pl.cdiv(B, tm)
    b_pad = grid_len * tm
    return tm, grid_len, b_pad


# ----------------------------------------------------------------------------
# Kernel: one batch tile through all 8 fused (Linear [+folded BN]) -> ReLU layers
# ----------------------------------------------------------------------------
def autoencoder_kernel(x_ref, w_ref, b_ref, out_ref):
    # x_ref: (TM, D) bf16, w_ref: (8, D, D) bf16, b_ref: (8, 1, D) f32
    h = x_ref[...]                                   # bf16 activations
    for l in range(NUM_LAYERS):
        acc = jnp.dot(h, w_ref[l], preferred_element_type=jnp.float32)
        h = jnp.maximum(acc + b_ref[l], 0.0).astype(jnp.bfloat16)
    out_ref[...] = h                                 # bf16 lane-dense store


# ----------------------------------------------------------------------------
# Glue: fold BN, transpose, pad to a common 128-lane multiple, pack, cast bf16
# ----------------------------------------------------------------------------
def prepare_kernel_params(params, eps=1e-5, mxu_dtype=jnp.bfloat16):
    """params in PyTorch layout: Linear.weight [out, in], Linear.bias [out],
    BatchNorm1d gamma/beta/running_mean/running_var [out].

    Returns (w_packed [8, D, D] bf16, b_packed [8, 1, D] f32, D)."""
    folded = []
    # encoder: fold eval-mode BN into the linear
    for i in range(1, 5):
        w = params[f"enc{i}_w"].astype(jnp.float32)          # [out, in]
        b = params[f"enc{i}_b"].astype(jnp.float32)          # [out]
        scale = params[f"bn{i}_gamma"] / jnp.sqrt(params[f"bn{i}_var"] + eps)
        shift = params[f"bn{i}_beta"] - params[f"bn{i}_mean"] * scale
        folded.append((w.T * scale[None, :], b * scale + shift))   # ([in,out],[out])
    # decoder: plain linears
    for i in range(1, 5):
        folded.append((params[f"dec{i}_w"].astype(jnp.float32).T,
                       params[f"dec{i}_b"].astype(jnp.float32)))

    # common padded feature dim
    D = max(_round_up(max(w.shape[0], w.shape[1]), LANE) for w, _ in folded)

    w_packed = jnp.stack([
        jnp.pad(w, ((0, D - w.shape[0]), (0, D - w.shape[1]))).astype(mxu_dtype)
        for w, _ in folded])                                   # [8, D, D] bf16
    b_packed = jnp.stack([
        jnp.pad(b, (0, D - b.shape[0])).reshape(1, D).astype(jnp.float32)
        for _, b in folded])                                   # [8, 1, D] f32
    return w_packed, b_packed, D


def autoencoder_forward(x, w_packed, b_packed):
    """x: [B, visible_dim] float. Returns [B, visible_dim] bfloat16."""
    B, d_in = x.shape
    D = w_packed.shape[-1]

    tm, grid_len, b_pad = _choose_tiling(B)
    x_pad = jnp.pad(x, ((0, b_pad - B), (0, D - d_in))).astype(jnp.bfloat16)

    flops = 2 * b_pad * NUM_LAYERS * D * D
    bytes_accessed = (x_pad.size * 2 + b_pad * D * 2 +
                      w_packed.size * 2 + b_packed.size * 4)

    out = pl.pallas_call(
        autoencoder_kernel,
        out_shape=jax.ShapeDtypeStruct((b_pad, D), jnp.bfloat16),
        grid=(grid_len,),
        in_specs=[
            pl.BlockSpec((tm, D), lambda i: (i, 0)),                      # x tile
            pl.BlockSpec((NUM_LAYERS, D, D), lambda i: (0, 0, 0)),        # weights (resident)
            pl.BlockSpec((NUM_LAYERS, 1, D), lambda i: (0, 0, 0)),        # biases  (resident)
        ],
        out_specs=pl.BlockSpec((tm, D), lambda i: (i, 0)),
        compiler_params=pltpu.CompilerParams(
            dimension_semantics=("parallel",)),
        cost_estimate=pl.CostEstimate(flops=flops, transcendentals=0,
                                      bytes_accessed=bytes_accessed),
    )(x_pad, w_packed, b_packed)
    return out[:B, :d_in]


# ----------------------------------------------------------------------------
# Synthetic parameters (PyTorch layout) and pure-JAX f32 reference
# ----------------------------------------------------------------------------
def make_params(key, visible_dim, c1, c2, c3, c4):
    enc_dims = [visible_dim, c1, c2, c3, c4]
    dec_dims = [c4, c3, c2, c1, visible_dim]
    params = {}
    keys = jax.random.split(key, 40)
    ki = 0
    for i in range(1, 5):
        fi, fo = enc_dims[i - 1], enc_dims[i]
        params[f"enc{i}_w"] = jax.random.normal(keys[ki], (fo, fi), jnp.float32) / jnp.sqrt(fi); ki += 1
        params[f"enc{i}_b"] = 0.05 * jax.random.normal(keys[ki], (fo,), jnp.float32); ki += 1
        params[f"bn{i}_gamma"] = 1.0 + 0.1 * jax.random.normal(keys[ki], (fo,), jnp.float32); ki += 1
        params[f"bn{i}_beta"] = 0.05 * jax.random.normal(keys[ki], (fo,), jnp.float32); ki += 1
        params[f"bn{i}_mean"] = 0.1 * jax.random.normal(keys[ki], (fo,), jnp.float32); ki += 1
        params[f"bn{i}_var"] = 1.0 + 0.1 * jax.random.uniform(keys[ki], (fo,), jnp.float32); ki += 1
    for i in range(1, 5):
        fi, fo = dec_dims[i - 1], dec_dims[i]
        params[f"dec{i}_w"] = jax.random.normal(keys[ki], (fo, fi), jnp.float32) / jnp.sqrt(fi); ki += 1
        params[f"dec{i}_b"] = 0.05 * jax.random.normal(keys[ki], (fo,), jnp.float32); ki += 1
    return params


def reference_forward(x, params, eps=1e-5):
    """Eval-mode PyTorch semantics in pure f32 JAX."""
    h = x.astype(jnp.float32)
    for i in range(1, 5):
        h = h @ params[f"enc{i}_w"].T + params[f"enc{i}_b"]
        scale = params[f"bn{i}_gamma"] / jnp.sqrt(params[f"bn{i}_var"] + eps)
        h = (h - params[f"bn{i}_mean"]) * scale + params[f"bn{i}_beta"]
        h = jnp.maximum(h, 0.0)          # dropout is identity in eval mode
    for i in range(1, 5):
        h = jnp.maximum(h @ params[f"dec{i}_w"].T + params[f"dec{i}_b"], 0.0)
    return h


if __name__ == "__main__":
    # Small shapes consistent with the module's constructor args.
    visible_dim, c1, c2, c3, c4 = 64, 48, 32, 24, 16
    batch = 8

    key = jax.random.PRNGKey(0)
    kx, kp = jax.random.split(key)
    x = jax.random.normal(kx, (batch, visible_dim), jnp.float32)
    params = make_params(kp, visible_dim, c1, c2, c3, c4)
    w_packed, b_packed, _ = prepare_kernel_params(params)

    out = autoencoder_forward(x, w_packed, b_packed)
    out = jax.block_until_ready(out)

    ref = reference_forward(x, params)
    assert out.shape == (batch, visible_dim)
    # bf16 operands / activations / output (f32 accumulation) across 8 chained
    # matmuls -> loosened tolerance vs the pure-f32 reference.
    out_f32 = out.astype(jnp.float32)
    max_err = float(jnp.max(jnp.abs(out_f32 - ref)))
    assert jnp.allclose(out_f32, ref, atol=1e-1, rtol=5e-2), (
        f"mismatch vs JAX reference, max abs err {max_err}")

    print("KERNEL_OK")
</pallas_src>

<mosaic_0001>
module attributes {stable_mosaic.version = 11 : i64} {
  func.func @autoencoder_kernel(%arg0: i32, %arg1: memref<16x128xbf16, #tpu.memory_space<vmem>>, %arg2: memref<8x128x128xbf16, #tpu.memory_space<vmem>>, %arg3: memref<8x1x128xf32, #tpu.memory_space<vmem>>, %arg4: memref<16x128xbf16, #tpu.memory_space<vmem>>) attributes {dimension_semantics = [#tpu.dimension_semantics<parallel>], iteration_bounds = array<i64: 1>, scalar_prefetch = 0 : i64, scratch_operands = 0 : i64, tpu.core_type = #tpu.core_type<tc>, window_params = [{transform_indices = @transform_0, window_bounds = array<i64: 16, 128>}, {pipeline_mode = #tpu.pipeline_mode<synchronous>, transform_indices = @transform_1, window_bounds = array<i64: 8, 128, 128>}, {pipeline_mode = #tpu.pipeline_mode<synchronous>, transform_indices = @transform_2, window_bounds = array<i64: 8, 1, 128>}, {transform_indices = @transform_3, window_bounds = array<i64: 16, 128>}]} {
    %c0 = arith.constant 0 : index
    %c0_0 = arith.constant 0 : index
    %0 = vector.load %arg1[%c0, %c0_0] : memref<16x128xbf16, #tpu.memory_space<vmem>>, vector<16x128xbf16>
    %c0_1 = arith.constant 0 : index
    %c0_2 = arith.constant 0 : index
    %c0_3 = arith.constant 0 : index
    %1 = vector.load %arg2[%c0_1, %c0_2, %c0_3] : memref<8x128x128xbf16, #tpu.memory_space<vmem>>, vector<1x128x128xbf16>
    %2 = vector.shape_cast %1 : vector<1x128x128xbf16> to vector<128x128xbf16>
    %cst = arith.constant dense<0.000000e+00> : vector<16x128xf32>
    %3 = tpu.matmul %0, %2, %cst {dimension_numbers = #tpu.dot_dimension_numbers<[1], [0], [0], [1], [0, 0, 1, 1], [], []>} : vector<16x128xbf16>, vector<128x128xbf16>, vector<16x128xf32> -> vector<16x128xf32>
    %c0_4 = arith.constant 0 : index
    %c0_5 = arith.constant 0 : index
    %c0_6 = arith.constant 0 : index
    %4 = vector.load %arg3[%c0_4, %c0_5, %c0_6] : memref<8x1x128xf32, #tpu.memory_space<vmem>>, vector<1x1x128xf32>
    %5 = vector.shape_cast %4 : vector<1x1x128xf32> to vector<1x128xf32>
    %6 = vector.broadcast %5 : vector<1x128xf32> to vector<16x128xf32>
    %7 = arith.addf %3, %6 : vector<16x128xf32>
    %cst_7 = arith.constant 0.000000e+00 : f32
    %8 = vector.broadcast %cst_7 : f32 to vector<16x128xf32>
    %9 = arith.maximumf %7, %8 : vector<16x128xf32>
    %10 = arith.truncf %9 : vector<16x128xf32> to vector<16x128xbf16>
    %c1 = arith.constant 1 : index
    %c0_8 = arith.constant 0 : index
    %c0_9 = arith.constant 0 : index
    %11 = vector.load %arg2[%c1, %c0_8, %c0_9] : memref<8x128x128xbf16, #tpu.memory_space<vmem>>, vector<1x128x128xbf16>
    %12 = vector.shape_cast %11 : vector<1x128x128xbf16> to vector<128x128xbf16>
    %cst_10 = arith.constant dense<0.000000e+00> : vector<16x128xf32>
    %13 = tpu.matmul %10, %12, %cst_10 {dimension_numbers = #tpu.dot_dimension_numbers<[1], [0], [0], [1], [0, 0, 1, 1], [], []>} : vector<16x128xbf16>, vector<128x128xbf16>, vector<16x128xf32> -> vector<16x128xf32>
    %c1_11 = arith.constant 1 : index
    %c0_12 = arith.constant 0 : index
    %c0_13 = arith.constant 0 : index
    %14 = vector.load %arg3[%c1_11, %c0_12, %c0_13] : memref<8x1x128xf32, #tpu.memory_space<vmem>>, vector<1x1x128xf32>
    %15 = vector.shape_cast %14 : vector<1x1x128xf32> to vector<1x128xf32>
    %16 = vector.broadcast %15 : vector<1x128xf32> to vector<16x128xf32>
    %17 = arith.addf %13, %16 : vector<16x128xf32>
    %cst_14 = arith.constant 0.000000e+00 : f32
    %18 = vector.broadcast %cst_14 : f32 to vector<16x128xf32>
    %19 = arith.maximumf %17, %18 : vector<16x128xf32>
    %20 = arith.truncf %19 : vector<16x128xf32> to vector<16x128xbf16>
    %c2 = arith.constant 2 : index
    %c0_15 = arith.constant 0 : index
    %c0_16 = arith.constant 0 : index
    %21 = vector.load %arg2[%c2, %c0_15, %c0_16] : memref<8x128x128xbf16, #tpu.memory_space<vmem>>, vector<1x128x128xbf16>
    %22 = vector.shape_cast %21 : vector<1x128x128xbf16> to vector<128x128xbf16>
    %cst_17 = arith.constant dense<0.000000e+00> : vector<16x128xf32>
    %23 = tpu.matmul %20, %22, %cst_17 {dimension_numbers = #tpu.dot_dimension_numbers<[1], [0], [0], [1], [0, 0, 1, 1], [], []>} : vector<16x128xbf16>, vector<128x128xbf16>, vector<16x128xf32> -> vector<16x128xf32>
    %c2_18 = arith.constant 2 : index
    %c0_19 = arith.constant 0 : index
    %c0_20 = arith.constant 0 : index
    %24 = vector.load %arg3[%c2_18, %c0_19, %c0_20] : memref<8x1x128xf32, #tpu.memory_space<vmem>>, vector<1x1x128xf32>
    %25 = vector.shape_cast %24 : vector<1x1x128xf32> to vector<1x128xf32>
    %26 = vector.broadcast %25 : vector<1x128xf32> to vector<16x128xf32>
    %27 = arith.addf %23, %26 : vector<16x128xf32>
    %cst_21 = arith.constant 0.000000e+00 : f32
    %28 = vector.broadcast %cst_21 : f32 to vector<16x128xf32>
    %29 = arith.maximumf %27, %28 : vector<16x128xf32>
    %30 = arith.truncf %29 : vector<16x128xf32> to vector<16x128xbf16>
    %c3 = arith.constant 3 : index
    %c0_22 = arith.constant 0 : index
    %c0_23 = arith.constant 0 : index
    %31 = vector.load %arg2[%c3, %c0_22, %c0_23] : memref<8x128x128xbf16, #tpu.memory_space<vmem>>, vector<1x128x128xbf16>
    %32 = vector.shape_cast %31 : vector<1x128x128xbf16> to vector<128x128xbf16>
    %cst_24 = arith.constant dense<0.000000e+00> : vector<16x128xf32>
    %33 = tpu.matmul %30, %32, %cst_24 {dimension_numbers = #tpu.dot_dimension_numbers<[1], [0], [0], [1], [0, 0, 1, 1], [], []>} : vector<16x128xbf16>, vector<128x128xbf16>, vector<16x128xf32> -> vector<16x128xf32>
    %c3_25 = arith.constant 3 : index
    %c0_26 = arith.constant 0 : index
    %c0_27 = arith.constant 0 : index
    %34 = vector.load %arg3[%c3_25, %c0_26, %c0_27] : memref<8x1x128xf32, #tpu.memory_space<vmem>>, vector<1x1x128xf32>
    %35 = vector.shape_cast %34 : vector<1x1x128xf32> to vector<1x128xf32>
    %36 = vector.broadcast %35 : vector<1x128xf32> to vector<16x128xf32>
    %37 = arith.addf %33, %36 : vector<16x128xf32>
    %cst_28 = arith.constant 0.000000e+00 : f32
    %38 = vector.broadcast %cst_28 : f32 to vector<16x128xf32>
    %39 = arith.maximumf %37, %38 : vector<16x128xf32>
    %40 = arith.truncf %39 : vector<16x128xf32> to vector<16x128xbf16>
    %c4 = arith.constant 4 : index
    %c0_29 = arith.constant 0 : index
    %c0_30 = arith.constant 0 : index
    %41 = vector.load %arg2[%c4, %c0_29, %c0_30] : memref<8x128x128xbf16, #tpu.memory_space<vmem>>, vector<1x128x128xbf16>
    %42 = vector.shape_cast %41 : vector<1x128x128xbf16> to vector<128x128xbf16>
    %cst_31 = arith.constant dense<0.000000e+00> : vector<16x128xf32>
    %43 = tpu.matmul %40, %42, %cst_31 {dimension_numbers = #tpu.dot_dimension_numbers<[1], [0], [0], [1], [0, 0, 1, 1], [], []>} : vector<16x128xbf16>, vector<128x128xbf16>, vector<16x128xf32> -> vector<16x128xf32>
    %c4_32 = arith.constant 4 : index
    %c0_33 = arith.constant 0 : index
    %c0_34 = arith.constant 0 : index
    %44 = vector.load %arg3[%c4_32, %c0_33, %c0_34] : memref<8x1x128xf32, #tpu.memory_space<vmem>>, vector<1x1x128xf32>
    %45 = vector.shape_cast %44 : vector<1x1x128xf32> to vector<1x128xf32>
    %46 = vector.broadcast %45 : vector<1x128xf32> to vector<16x128xf32>
    %47 = arith.addf %43, %46 : vector<16x128xf32>
    %cst_35 = arith.constant 0.000000e+00 : f32
    %48 = vector.broadcast %cst_35 : f32 to vector<16x128xf32>
    %49 = arith.maximumf %47, %48 : vector<16x128xf32>
    %50 = arith.truncf %49 : vector<16x128xf32> to vector<16x128xbf16>
    %c5 = arith.constant 5 : index
    %c0_36 = arith.constant 0 : index
    %c0_37 = arith.constant 0 : index
    %51 = vector.load %arg2[%c5, %c0_36, %c0_37] : memref<8x128x128xbf16, #tpu.memory_space<vmem>>, vector<1x128x128xbf16>
    %52 = vector.shape_cast %51 : vector<1x128x128xbf16> to vector<128x128xbf16>
    %cst_38 = arith.constant dense<0.000000e+00> : vector<16x128xf32>
    %53 = tpu.matmul %50, %52, %cst_38 {dimension_numbers = #tpu.dot_dimension_numbers<[1], [0], [0], [1], [0, 0, 1, 1], [], []>} : vector<16x128xbf16>, vector<128x128xbf16>, vector<16x128xf32> -> vector<16x128xf32>
    %c5_39 = arith.constant 5 : index
    %c0_40 = arith.constant 0 : index
    %c0_41 = arith.constant 0 : index
    %54 = vector.load %arg3[%c5_39, %c0_40, %c0_41] : memref<8x1x128xf32, #tpu.memory_space<vmem>>, vector<1x1x128xf32>
    %55 = vector.shape_cast %54 : vector<1x1x128xf32> to vector<1x128xf32>
    %56 = vector.broadcast %55 : vector<1x128xf32> to vector<16x128xf32>
    %57 = arith.addf %53, %56 : vector<16x128xf32>
    %cst_42 = arith.constant 0.000000e+00 : f32
    %58 = vector.broadcast %cst_42 : f32 to vector<16x128xf32>
    %59 = arith.maximumf %57, %58 : vector<16x128xf32>
    %60 = arith.truncf %59 : vector<16x128xf32> to vector<16x128xbf16>
    %c6 = arith.constant 6 : index
    %c0_43 = arith.constant 0 : index
    %c0_44 = arith.constant 0 : index
    %61 = vector.load %arg2[%c6, %c0_43, %c0_44] : memref<8x128x128xbf16, #tpu.memory_space<vmem>>, vector<1x128x128xbf16>
    %62 = vector.shape_cast %61 : vector<1x128x128xbf16> to vector<128x128xbf16>
    %cst_45 = arith.constant dense<0.000000e+00> : vector<16x128xf32>
    %63 = tpu.matmul %60, %62, %cst_45 {dimension_numbers = #tpu.dot_dimension_numbers<[1], [0], [0], [1], [0, 0, 1, 1], [], []>} : vector<16x128xbf16>, vector<128x128xbf16>, vector<16x128xf32> -> vector<16x128xf32>
    %c6_46 = arith.constant 6 : index
    %c0_47 = arith.constant 0 : index
    %c0_48 = arith.constant 0 : index
    %64 = vector.load %arg3[%c6_46, %c0_47, %c0_48] : memref<8x1x128xf32, #tpu.memory_space<vmem>>, vector<1x1x128xf32>
    %65 = vector.shape_cast %64 : vector<1x1x128xf32> to vector<1x128xf32>
    %66 = vector.broadcast %65 : vector<1x128xf32> to vector<16x128xf32>
    %67 = arith.addf %63, %66 : vector<16x128xf32>
    %cst_49 = arith.constant 0.000000e+00 : f32
    %68 = vector.broadcast %cst_49 : f32 to vector<16x128xf32>
    %69 = arith.maximumf %67, %68 : vector<16x128xf32>
    %70 = arith.truncf %69 : vector<16x128xf32> to vector<16x128xbf16>
    %c7 = arith.constant 7 : index
    %c0_50 = arith.constant 0 : index
    %c0_51 = arith.constant 0 : index
    %71 = vector.load %arg2[%c7, %c0_50, %c0_51] : memref<8x128x128xbf16, #tpu.memory_space<vmem>>, vector<1x128x128xbf16>
    %72 = vector.shape_cast %71 : vector<1x128x128xbf16> to vector<128x128xbf16>
    %cst_52 = arith.constant dense<0.000000e+00> : vector<16x128xf32>
    %73 = tpu.matmul %70, %72, %cst_52 {dimension_numbers = #tpu.dot_dimension_numbers<[1], [0], [0], [1], [0, 0, 1, 1], [], []>} : vector<16x128xbf16>, vector<128x128xbf16>, vector<16x128xf32> -> vector<16x128xf32>
    %c7_53 = arith.constant 7 : index
    %c0_54 = arith.constant 0 : index
    %c0_55 = arith.constant 0 : index
    %74 = vector.load %arg3[%c7_53, %c0_54, %c0_55] : memref<8x1x128xf32, #tpu.memory_space<vmem>>, vector<1x1x128xf32>
    %75 = vector.shape_cast %74 : vector<1x1x128xf32> to vector<1x128xf32>
    %76 = vector.broadcast %75 : vector<1x128xf32> to vector<16x128xf32>
    %77 = arith.addf %73, %76 : vector<16x128xf32>
    %cst_56 = arith.constant 0.000000e+00 : f32
    %78 = vector.broadcast %cst_56 : f32 to vector<16x128xf32>
    %79 = arith.maximumf %77, %78 : vector<16x128xf32>
    %80 = arith.truncf %79 : vector<16x128xf32> to vector<16x128xbf16>
    %c0_57 = arith.constant 0 : index
    %c0_58 = arith.constant 0 : index
    %81 = vector.load %arg4[%c0_57, %c0_58] : memref<16x128xbf16, #tpu.memory_space<vmem>>, vector<16x128xbf16>
    tpu.vector_store %arg4[%c0_57, %c0_58], %80 {strides = array<i32>} : memref<16x128xbf16, #tpu.memory_space<vmem>>, vector<16x128xbf16>,
    return
  }
  func.func @transform_0(%arg0: i32) -> (i32, i32) {
    %c0_i32 = arith.constant 0 : i32
    %c0_i32_0 = arith.constant 0 : i32
    return %arg0, %c0_i32 : i32, i32
  }
  func.func @transform_1(%arg0: i32) -> (i32, i32, i32) {
    %c0_i32 = arith.constant 0 : i32
    %c0_i32_0 = arith.constant 0 : i32
    %c0_i32_1 = arith.constant 0 : i32
    %c0_i32_2 = arith.constant 0 : i32
    return %c0_i32, %c0_i32_0, %c0_i32_1 : i32, i32, i32
  }
  func.func @transform_2(%arg0: i32) -> (i32, i32, i32) {
    %c0_i32 = arith.constant 0 : i32
    %c0_i32_0 = arith.constant 0 : i32
    %c0_i32_1 = arith.constant 0 : i32
    %c0_i32_2 = arith.constant 0 : i32
    return %c0_i32, %c0_i32_0, %c0_i32_1 : i32, i32, i32
  }
  func.func @transform_3(%arg0: i32) -> (i32, i32) {
    %c0_i32 = arith.constant 0 : i32
    %c0_i32_0 = arith.constant 0 : i32
    return %arg0, %c0_i32 : i32, i32
  }
}

</mosaic_0001>

<bundles_post_ra>
// kernel: tpu_custom_call.1
= control target key start
LH: loop header
LB: loop body
LE: loop exit
PB: predicated region body
PF: predicated region fallthrough
CT: control target
= control target key end

     0   :  { %8 = vsyncpa [#allocation3], 0  ;;  %s1284_s0 = inlined_call_operand.hbm [shape: bf16[16,128], index: 0, kind: input, shape index: {}]   ;;  %s1285_s1 = inlined_call_operand.hbm [shape: bf16[8,128,128], index: 1, kind: input, shape index: {}]   ;;  %s1286_s2 = inlined_call_operand.hbm [shape: f32[8,1,128], index: 2, kind: input, shape index: {}]   ;;  %s1287_s3 = inlined_call_operand.hbm [shape: bf16[16,128], index: 3, kind: output, shape index: {}]  }
   0x1   :  { %9 = vsyncpa [#allocation6], 0 }
   0x2   :  { %10 = vsyncpa [#allocation4], 0  ;;  %s28_s14 = sshll.u32 %s1285_s1, 4  ;;  %s1235_s15 = smov [#allocation5]   ;;  %s29_s14 = int_to_ptr.hbm [resolvable:$true] %s28_s14 }
   0x3   :  { %s30_s16 = sshll.u32 %s1235_s15, 4  ;;  %s15_s19 = sshll.u32 %s1284_s0, 4  ;;  %s31_s16 = int_to_ptr.vmem [resolvable:$true] %s30_s16  ;;  %s16_s19 = int_to_ptr.hbm [resolvable:$true] %s15_s19 }
   0x4   :  { %s1236_s20 = smov 64   ;;  %s1237_s21 = smov 4  }
   0x5   :  { %36 = dma.hbm_to_vmem [thread:$0]  %s29_s14, 8192, %s31_s16, [#allocation6], %s1236_s20, %s1236_s20, %s1237_s21  }
   0x6   :  { %s1238_s22 = smov [#allocation2]   ;;  %s41_s1 = sshll.u32 %s1286_s2, 4  ;;  %s42_s1 = int_to_ptr.hbm [resolvable:$true] %s41_s1 }
   0x7   :  { %s17_s23 = sshll.u32 %s1238_s22, 4  ;;  %s1239_s0 = smov [#allocation7]   ;;  %s18_s23 = int_to_ptr.vmem [resolvable:$true] %s17_s23 }
   0x8   :  { %23 = dma.hbm_to_vmem [thread:$0]  %s16_s19, 128, %s18_s23, [#allocation3], %s1236_s20, %s1236_s20, %s1237_s21  }
   0x9   :  { %s43_s26 = sshll.u32 %s1239_s0, 4  ;;  %s1240_s27 = smov 16   ;;  %s44_s26 = int_to_ptr.vmem [resolvable:$true] %s43_s26 }
   0xa   :  { %s1241_s28 = smov 1  }
   0xb   :  { %49 = dma.hbm_to_vmem [thread:$0]  %s42_s1, 128, %s44_s26, [#allocation6], %s1240_s27, %s1240_s27, %s1241_s28  }
   0xc   :  { %1229 = dma.done.wait [#allocation3], 128  }
   0xd   :  { %1230 = vsyncadd [#allocation3], 4294967168 }
   0xe   :  { %1231 = dma.done.wait [#allocation6], 8320  }
   0xf   :  { %1232 = vsyncadd [#allocation6], 4294958976  ;;  %v1055_v0 = vld [vmem:[#allocation5 + $0x38] sm:$0xff]  ;;  %v1054_v1 = vld [vmem:[#allocation5 + $0x30] sm:$0xff]  ;;  %s1242_s2 = smov [#allocation8]   ;;  %s773_s5 = sshll.u32 %s1287_s3, 4  ;;  %s774_s5 = int_to_ptr.hbm [resolvable:$true] %s773_s5 }
  0x10   :  { %138 = vmatpush.bf16.msra.mxu0 %v1055_v0  ;;  %v1063_v2 = vld [vmem:[#allocation5 + $0x78] sm:$0xff]  ;;  %v1053_v3 = vld [vmem:[#allocation5 + $0x28] sm:$0xff]  ;;  %v1062_v4 = vld [vmem:[#allocation5 + $0x70] sm:$0xff]  ;;  %s771_s29 = sshll.u32 %s1242_s2, 4  ;;  %s772_s29 = int_to_ptr.vmem [resolvable:$true] %s771_s29 }
  0x11   :  { %225 = vmatpush.bf16.msra.mxu1 %v1063_v2  ;;  %v1061_v5 = vld [vmem:[#allocation5 + $0x68] sm:$0xff]  ;;  %v1052_v6 = vld [vmem:[#allocation5 + $0x20] sm:$0xff]  ;;  %v1051_v8 = vld [vmem:[#allocation5 + $0x18] sm:$0xff] }
  0x12   :  { %v1060_v7 = vld [vmem:[#allocation5 + $0x60] sm:$0xff]  ;;  %v1050_v9 = vld [vmem:[#allocation5 + $0x10] sm:$0xff]  ;;  %v1049_v10 = vld [vmem:[#allocation5 + $0x8] sm:$0xff] }
  0x13   :  { %v1048_v11 = vld [vmem:[#allocation5] sm:$0xff]  ;;  %v1047_v12 = vld [vmem:[#allocation2] sm:$0xff]  ;;  %v1058_v14 = vld [vmem:[#allocation5 + $0x50] sm:$0xff] }
  0x14   :  { %139 = vmatpush.bf16.msra.mxu0 %v1054_v1  ;;  %v1059_v13 = vld [vmem:[#allocation5 + $0x58] sm:$0xff]  ;;  %v1057_v15 = vld [vmem:[#allocation5 + $0x48] sm:$0xff]  ;;  %v1056_v16 = vld [vmem:[#allocation5 + $0x40] sm:$0xff] }
  0x15   :  { %226 = vmatpush.bf16.msra.mxu1 %v1062_v4  ;;  %v1071_v17 = vld [vmem:[#allocation5 + $0xb8] sm:$0xff]  ;;  %v1070_v18 = vld [vmem:[#allocation5 + $0xb0] sm:$0xff]  ;;  %v1069_v19 = vld [vmem:[#allocation5 + $0xa8] sm:$0xff] }
  0x16   :  { %312 = vmatpush.bf16.msra.mxu2 %v1071_v17  ;;  %v1068_v20 = vld [vmem:[#allocation5 + $0xa0] sm:$0xff]  ;;  %v1067_v29 = vld [vmem:[#allocation5 + $0x98] sm:$0xff]  ;;  %v1066_v30 = vld [vmem:[#allocation5 + $0x90] sm:$0xff] }
  0x17   :  { %v1125_v22 = vld [vmem:[#allocation7] ss:$0 sm:$0xff]  ;;  %v1065_v31 = vld [vmem:[#allocation5 + $0x88] sm:$0xff]  ;;  %v1079_v33 = vld [vmem:[#allocation5 + $0xf8] sm:$0xff] }
  0x18   :  { %140 = vmatpush.bf16.msra.mxu0 %v1053_v3  ;;  %v1064_v32 = vld [vmem:[#allocation5 + $0x80] sm:$0xff]  ;;  %399 = vmatpush.bf16.msra.mxu3 %v1079_v33  ;;  %v1078_v34 = vld [vmem:[#allocation5 + $0xf0] sm:$0xff]  ;;  %v1077_v35 = vld [vmem:[#allocation5 + $0xe8] sm:$0xff] }
  0x19   :  { %227 = vmatpush.bf16.msra.mxu1 %v1061_v5  ;;  %v1076_v36 = vld [vmem:[#allocation5 + $0xe0] sm:$0xff]  ;;  %v1075_v45 = vld [vmem:[#allocation5 + $0xd8] sm:$0xff]  ;;  %v1074_v46 = vld [vmem:[#allocation5 + $0xd0] sm:$0xff] }
  0x1a   :  { %313 = vmatpush.bf16.msra.mxu2 %v1070_v18  ;;  %v1126_v38 = vld [vmem:[#allocation7 + $0x1] ss:$0 sm:$0xff]  ;;  %v1073_v47 = vld [vmem:[#allocation5 + $0xc8] sm:$0xff]  ;;  %v1087_v49 = vld [vmem:[#allocation5 + $0x138] sm:$0xff] }
  0x1b   :  { %v1072_v48 = vld [vmem:[#allocation5 + $0xc0] sm:$0xff]  ;;  %v1086_v50 = vld [vmem:[#allocation5 + $0x130] sm:$0xff]  ;;  %v1085_v51 = vld [vmem:[#allocation5 + $0x128] sm:$0xff] }
  0x1c   :  { %141 = vmatpush.bf16.msra.mxu0 %v1052_v6  ;;  %400 = vmatpush.bf16.msra.mxu3 %v1078_v34  ;;  %v1084_v52 = vld [vmem:[#allocation5 + $0x120] sm:$0xff]  ;;  %v1083_v61 = vld [vmem:[#allocation5 + $0x118] sm:$0xff]  ;;  %v1082_v62 = vld [vmem:[#allocation5 + $0x110] sm:$0xff] }
  0x1d   :  { %228 = vmatpush.bf16.msra.mxu1 %v1060_v7  ;;  %v1127_v54 = vld [vmem:[#allocation7 + $0x2] ss:$0 sm:$0xff]  ;;  %v1081_v63 = vld [vmem:[#allocation5 + $0x108] sm:$0xff]  ;;  %v1095_v1 = vld [vmem:[#allocation5 + $0x178] sm:$0xff] }
  0x1e   :  { %314 = vmatpush.bf16.msra.mxu2 %v1069_v19  ;;  %v1080_v0 = vld [vmem:[#allocation5 + $0x100] sm:$0xff]  ;;  %v1094_v2 = vld [vmem:[#allocation5 + $0x170] sm:$0xff]  ;;  %v1093_v3 = vld [vmem:[#allocation5 + $0x168] sm:$0xff] }
  0x1f   :  { %v1092_v4 = vld [vmem:[#allocation5 + $0x160] sm:$0xff]  ;;  %v1103_v17 = vld [vmem:[#allocation5 + $0x1b8] sm:$0xff]  ;;  %v1102_v18 = vld [vmem:[#allocation5 + $0x1b0] sm:$0xff] }
  0x20   :  { %142 = vmatpush.bf16.msra.mxu0 %v1051_v8  ;;  %401 = vmatpush.bf16.msra.mxu3 %v1077_v35  ;;  %v1128_v6 = vld [vmem:[#allocation7 + $0x3] ss:$0 sm:$0xff]  ;;  %v1101_v19 = vld [vmem:[#allocation5 + $0x1a8] sm:$0xff]  ;;  %v1111_v33 = vld [vmem:[#allocation5 + $0x1f8] sm:$0xff] }
  0x21   :  { %229 = vmatpush.bf16.msra.mxu1 %v1059_v13  ;;  %v1091_v13 = vld [vmem:[#allocation5 + $0x158] sm:$0xff]  ;;  %v1110_v34 = vld [vmem:[#allocation5 + $0x1f0] sm:$0xff]  ;;  %v1109_v35 = vld [vmem:[#allocation5 + $0x1e8] sm:$0xff] }
  0x22   :  { %315 = vmatpush.bf16.msra.mxu2 %v1068_v20  ;;  %v1100_v20 = vld [vmem:[#allocation5 + $0x1a0] sm:$0xff] }
  0x24   :  { %143 = vmatpush.bf16.msra.mxu0 %v1050_v9  ;;  %402 = vmatpush.bf16.msra.mxu3 %v1076_v36  ;;  %v1108_v36 = vld [vmem:[#allocation5 + $0x1e0] sm:$0xff] }
  0x25   :  { %230 = vmatpush.bf16.msra.mxu1 %v1058_v14  ;;  %v1090_v14 = vld [vmem:[#allocation5 + $0x150] sm:$0xff] }
  0x26   :  { %316 = vmatpush.bf16.msra.mxu2 %v1067_v29  ;;  %v1099_v29 = vld [vmem:[#allocation5 + $0x198] sm:$0xff] }
  0x28   :  { %144 = vmatpush.bf16.msra.mxu0 %v1049_v10  ;;  %403 = vmatpush.bf16.msra.mxu3 %v1075_v45  ;;  %v1107_v45 = vld [vmem:[#allocation5 + $0x1d8] sm:$0xff] }
  0x29   :  { %231 = vmatpush.bf16.msra.mxu1 %v1057_v15  ;;  %v1089_v15 = vld [vmem:[#allocation5 + $0x148] sm:$0xff] }
  0x2a   :  { %317 = vmatpush.bf16.msra.mxu2 %v1066_v30  ;;  %v1098_v30 = vld [vmem:[#allocation5 + $0x190] sm:$0xff] }
  0x2c   :  { %145 = vmatpush.bf16.msra.mxu0 %v1048_v11  ;;  %404 = vmatpush.bf16.msra.mxu3 %v1074_v46  ;;  %v1106_v46 = vld [vmem:[#allocation5 + $0x1d0] sm:$0xff] }
  0x2d   :  { %232 = vmatpush.bf16.msra.mxu1 %v1056_v16  ;;  %v1088_v16 = vld [vmem:[#allocation5 + $0x140] sm:$0xff] }
  0x2e   :  { %318 = vmatpush.bf16.msra.mxu2 %v1065_v31  ;;  %v1097_v31 = vld [vmem:[#allocation5 + $0x188] sm:$0xff] }
  0x2f   :  { %146 = vmatmul.bf16.vlgmr.msra.gmra.mxu0 %v1047_v12 }
  0x30   :  { %405 = vmatpush.bf16.msra.mxu3 %v1073_v47  ;;  %486 = vmatpush.bf16.msrb.mxu0 %v1087_v49  ;;  %v1105_v47 = vld [vmem:[#allocation5 + $0x1c8] sm:$0xff] }
  0x31   :  { %573 = vmatpush.bf16.msrb.mxu1 %v1095_v1 }
  0x32   :  { %319 = vmatpush.bf16.msra.mxu2 %v1064_v32  ;;  %v1096_v32 = vld [vmem:[#allocation5 + $0x180] sm:$0xff] }
  0x34   :  { %406 = vmatpush.bf16.msra.mxu3 %v1072_v48  ;;  %487 = vmatpush.bf16.msrb.mxu0 %v1086_v50  ;;  %v1104_v48 = vld [vmem:[#allocation5 + $0x1c0] sm:$0xff] }
  0x35   :  { %574 = vmatpush.bf16.msrb.mxu1 %v1094_v2  ;;  %v1131_v50 = vld [vmem:[#allocation7 + $0x6] ss:$0 sm:$0xff] }
  0x36   :  { %660 = vmatpush.bf16.msrb.mxu2 %v1103_v17 }
  0x38   :  { %488 = vmatpush.bf16.msrb.mxu0 %v1085_v51  ;;  %747 = vmatpush.bf16.msrb.mxu3 %v1111_v33 }
  0x39   :  { %575 = vmatpush.bf16.msrb.mxu1 %v1093_v3 }
  0x3a   :  { %661 = vmatpush.bf16.msrb.mxu2 %v1102_v18 }
  0x3c   :  { %489 = vmatpush.bf16.msrb.mxu0 %v1084_v52  ;;  %748 = vmatpush.bf16.msrb.mxu3 %v1110_v34 }
  0x3d   :  { %576 = vmatpush.bf16.msrb.mxu1 %v1092_v4 }
  0x3e   :  { %662 = vmatpush.bf16.msrb.mxu2 %v1101_v19 }
  0x40   :  { %490 = vmatpush.bf16.msrb.mxu0 %v1083_v61  ;;  %749 = vmatpush.bf16.msrb.mxu3 %v1109_v35 }
  0x41   :  { %577 = vmatpush.bf16.msrb.mxu1 %v1091_v13 }
  0x42   :  { %663 = vmatpush.bf16.msrb.mxu2 %v1100_v20 }
  0x44   :  { %491 = vmatpush.bf16.msrb.mxu0 %v1082_v62  ;;  %750 = vmatpush.bf16.msrb.mxu3 %v1108_v36 }
  0x45   :  { %578 = vmatpush.bf16.msrb.mxu1 %v1090_v14 }
  0x46   :  { %664 = vmatpush.bf16.msrb.mxu2 %v1099_v29 }
  0x48   :  { %492 = vmatpush.bf16.msrb.mxu0 %v1081_v63  ;;  %751 = vmatpush.bf16.msrb.mxu3 %v1107_v45 }
  0x49   :  { %579 = vmatpush.bf16.msrb.mxu1 %v1089_v15 }
  0x4a   :  { %665 = vmatpush.bf16.msrb.mxu2 %v1098_v30 }
  0x4c   :  { %493 = vmatpush.bf16.msrb.mxu0 %v1080_v0  ;;  %752 = vmatpush.bf16.msrb.mxu3 %v1106_v46 }
  0x4d   :  { %580 = vmatpush.bf16.msrb.mxu1 %v1088_v16 }
  0x4e   :  { %666 = vmatpush.bf16.msrb.mxu2 %v1097_v31 }
  0x50   :  { %753 = vmatpush.bf16.msrb.mxu3 %v1105_v47 }
  0x52   :  { %667 = vmatpush.bf16.msrb.mxu2 %v1096_v32 }
  0x54   :  { %754 = vmatpush.bf16.msrb.mxu3 %v1104_v48 }
  0xac   :  { %v147_v21 = vpop.f32.mrf.mxu0 }
  0xad   :  { %v148_v23 = vadd.f32 %v1125_v22, %v147_v21 }
  0xaf   :  { %v152_v26 = vmax.f32 %v148_v23, 0.0 }
  0xb4   :  { %v149_v24 = vpop.f32.mrf.mxu0 }
  0xb5   :  { %v150_v25 = vadd.f32 %v1125_v22, %v149_v24  ;;  %v1129_v22 = vld [vmem:[#allocation7 + $0x4] ss:$0 sm:$0xff] }
  0xb7   :  { %v153_v27 = vmax.f32 %v150_v25, 0.0 }
  0xb9   :  { %v154_v28 = vpack.c.bf16 %v153_v27, %v152_v26 }
  0xbb   :  { %233 = vmatmul.bf16.vlgmr.msra.gmra.mxu1 %v154_v28 }
 0x138   :  { %v234_v37 = vpop.f32.mrf.mxu1 }
 0x139   :  { %v235_v39 = vadd.f32 %v1126_v38, %v234_v37 }
 0x13b   :  { %v239_v42 = vmax.f32 %v235_v39, 0.0 }
 0x140   :  { %v236_v40 = vpop.f32.mrf.mxu1 }
 0x141   :  { %v237_v41 = vadd.f32 %v1126_v38, %v236_v40  ;;  %v1130_v38 = vld [vmem:[#allocation7 + $0x5] ss:$0 sm:$0xff] }
 0x143   :  { %v240_v43 = vmax.f32 %v237_v41, 0.0 }
 0x145   :  { %v241_v44 = vpack.c.bf16 %v240_v43, %v239_v42 }
 0x147   :  { %320 = vmatmul.bf16.vlgmr.msra.gmra.mxu2 %v241_v44 }
 0x1ca   :  { %v321_v53 = vpop.f32.mrf.mxu2 }
 0x1cb   :  { %v322_v55 = vadd.f32 %v1127_v54, %v321_v53 }
 0x1cd   :  { %v326_v58 = vmax.f32 %v322_v55, 0.0 }
 0x1d2   :  { %v323_v56 = vpop.f32.mrf.mxu2 }
 0x1d3   :  { %v324_v57 = vadd.f32 %v1127_v54, %v323_v56 }
 0x1d5   :  { %v327_v59 = vmax.f32 %v324_v57, 0.0 }
 0x1d7   :  { %v328_v60 = vpack.c.bf16 %v327_v59, %v326_v58  ;;  %v1132_v58 = vld [vmem:[#allocation7 + $0x7] ss:$0 sm:$0xff] }
 0x1d9   :  { %407 = vmatmul.bf16.vlgmr.msra.gmra.mxu3 %v328_v60 }
 0x25c   :  { %v408_v5 = vpop.f32.mrf.mxu3 }
 0x25d   :  { %v409_v7 = vadd.f32 %v1128_v6, %v408_v5 }
 0x25f   :  { %v413_v10 = vmax.f32 %v409_v7, 0.0 }
 0x264   :  { %v410_v8 = vpop.f32.mrf.mxu3 }
 0x265   :  { %v411_v9 = vadd.f32 %v1128_v6, %v410_v8 }
 0x267   :  { %v414_v11 = vmax.f32 %v411_v9, 0.0 }
 0x269   :  { %v415_v12 = vpack.c.bf16 %v414_v11, %v413_v10 }
 0x26b   :  { %494 = vmatmul.bf16.vlgmr.msrb.gmra.mxu0 %v415_v12 }
 0x2e8   :  { %v495_v21 = vpop.f32.mrf.mxu0 }
 0x2e9   :  { %v496_v23 = vadd.f32 %v1129_v22, %v495_v21 }
 0x2eb   :  { %v500_v26 = vmax.f32 %v496_v23, 0.0 }
 0x2f0   :  { %v497_v24 = vpop.f32.mrf.mxu0 }
 0x2f1   :  { %v498_v25 = vadd.f32 %v1129_v22, %v497_v24 }
 0x2f3   :  { %v501_v27 = vmax.f32 %v498_v25, 0.0 }
 0x2f5   :  { %v502_v28 = vpack.c.bf16 %v501_v27, %v500_v26 }
 0x2f7   :  { %581 = vmatmul.bf16.vlgmr.msrb.gmra.mxu1 %v502_v28 }
 0x374   :  { %v582_v37 = vpop.f32.mrf.mxu1 }
 0x375   :  { %v583_v39 = vadd.f32 %v1130_v38, %v582_v37 }
 0x377   :  { %v587_v42 = vmax.f32 %v583_v39, 0.0 }
 0x37c   :  { %v584_v40 = vpop.f32.mrf.mxu1 }
 0x37d   :  { %v585_v41 = vadd.f32 %v1130_v38, %v584_v40 }
 0x37f   :  { %v588_v43 = vmax.f32 %v585_v41, 0.0 }
 0x381   :  { %v589_v44 = vpack.c.bf16 %v588_v43, %v587_v42 }
 0x383   :  { %668 = vmatmul.bf16.vlgmr.msrb.gmra.mxu2 %v589_v44 }
 0x406   :  { %v669_v49 = vpop.f32.mrf.mxu2 }
 0x407   :  { %v670_v51 = vadd.f32 %v1131_v50, %v669_v49 }
 0x409   :  { %v674_v54 = vmax.f32 %v670_v51, 0.0 }
 0x40e   :  { %v671_v52 = vpop.f32.mrf.mxu2 }
 0x40f   :  { %v672_v53 = vadd.f32 %v1131_v50, %v671_v52 }
 0x411   :  { %v675_v55 = vmax.f32 %v672_v53, 0.0 }
 0x413   :  { %v676_v56 = vpack.c.bf16 %v675_v55, %v674_v54 }
 0x415   :  { %755 = vmatmul.bf16.vlgmr.msrb.gmra.mxu3 %v676_v56 }
 0x498   :  { %v756_v57 = vpop.f32.mrf.mxu3 }
 0x499   :  { %v757_v59 = vadd.f32 %v1132_v58, %v756_v57 }
 0x49b   :  { %v761_v62 = vmax.f32 %v757_v59, 0.0 }
 0x4a0   :  { %v758_v60 = vpop.f32.mrf.mxu3 }
 0x4a1   :  { %v759_v61 = vadd.f32 %v1132_v58, %v758_v60 }
 0x4a3   :  { %v762_v63 = vmax.f32 %v759_v61, 0.0 }
 0x4a5   :  { %v1115_v0 = vpack.c.bf16 %v762_v63, %v761_v62 }
 0x4a7   :  { %1116 = vst [vmem:[#allocation8] sm:$0xff] %v1115_v0  }
 0x4a8   :  { %779 = dma.vmem_to_hbm [thread:$0]  %s772_s29, 128, %s774_s5, [#allocation4], %s1236_s20, %s1236_s20, %s1237_s21  }
 0x4a9   :  { %1233 = dma.done.wait [#allocation4], 128  }
 0x4aa   :  { %1234 = vsyncadd [#allocation4], 4294967168 }
 0x4ab   :  { %784 = vsyncpa [#allocation3], 1 }
 0x4ac   :  { %785 = vsyncpa [#allocation6], 1 }
 0x4ad   :  { %786 = vsyncpa [#allocation4], 1 }

</bundles_post_ra>
